<compile_context>
chip_gen: v7x
topology: tpu7x:2x2x1
jax: 0.10.0
libtpu: 0.0.40
codegen_flags: <defaults>
</compile_context>

<pallas_src>
import jax
import jax.numpy as jnp
from jax.experimental import pallas as pl
from jax.experimental.pallas import tpu as pltpu


def _linear_kernel(x_ref, w_ref, b_ref, o_ref):
    """One batch tile of the packed matvec.

    x_ref: (TB, Fp)  packed batch tile (Fp = P*F lanes, lane-dense)
    w_ref: (M,  Fp)  block-diagonal packed weight (M = P rounded up to 8)
    b_ref: (1,)      f32 bias scalar in SMEM
    o_ref: (M,  TB)  lane-dense output tile: o[p, i] = x_row(i*P + p) . w + b
    """
    y = jax.lax.dot_general(
        w_ref[...], x_ref[...],
        dimension_numbers=(((1,), (1,)), ((), ())),   # contract the Fp lanes (A @ B^T form)
        preferred_element_type=jnp.float32,           # f32 accumulation on the MXU
    )                                                 # -> (M, TB)
    o_ref[...] = (y + b_ref[0]).astype(o_ref.dtype)


def _round_up(n, m):
    return -(-n // m) * m


def _vmem_capacity_bytes():
    """Physical per-core VMEM, with a conservative (v7x, 64 MiB) fallback."""
    default = 64 * 1024 * 1024
    try:
        cap = int(getattr(pltpu.get_tpu_info(), "vmem_capacity_bytes", default))
        return cap if cap > 0 else default
    except Exception:
        return default


def _pick_batch_tile(rows, row_bytes, target_bytes):
    """Largest multiple-of-256 row tile with x block <= target_bytes; prefers an
    even grid so ("parallel",) splits evenly across v7x's two TensorCores."""
    tb = max(1, target_bytes // max(1, row_bytes))
    if tb >= rows:
        return rows                                   # single full block (full extent legal)
    tb = min(rows, max(256, (tb // 256) * 256))       # sublane / dtype-packing aligned
    nt = pl.cdiv(rows, tb)
    if nt > 1 and nt % 2 == 1:                        # best-effort even grid (megacore)
        tb_even = _round_up(pl.cdiv(rows, nt + 1), 256)
        if 256 <= tb_even < rows and pl.cdiv(rows, tb_even) % 2 == 0:
            tb = tb_even
    return tb


def logistic_regression_reg_forward(x, weight, bias, *, batch_tile=None):
    """Forward of LogisticRegressionReg: (B, F) @ (F, 1) + b -> (B, 1).

    batch_tile (optional) is measured in rows of the *packed* kernel input.
    """
    B, F = x.shape
    out_dtype = jnp.result_type(x.dtype, weight.dtype)
    itemsize = jnp.dtype(x.dtype).itemsize

    # --- lane packing: put P consecutive rows in one 128-lane row for narrow F.
    if F < 128 and 128 % F == 0:
        pack = 128 // F
    else:
        pack = 1
        # TODO(synk): F that neither divides nor is a multiple of 128 still pays
        # lane padding on the x read; a remainder-lane path is not implemented.
    fp = pack * F                        # packed lane width
    bp = _round_up(B, pack)              # batch padded to a multiple of the pack
    rows = bp // pack                    # packed row count (the grid runs over these)

    if pack > 1:
        x_in = x if bp == B else jnp.pad(x, ((0, bp - B), (0, 0)))
        x_in = x_in.reshape(rows, fp)    # packed row i holds logical rows i*P .. i*P+P-1
    else:
        x_in = x

    # Block-diagonal packed weight: w_blk[p, q*F + j] = (p == q) * W[j], zero-padded
    # to M = round_up(P, 8) rows so the weight tile and output tile are sublane
    # aligned (the padding rows produce discarded outputs).
    w_row = weight.reshape(1, F).astype(jnp.float32)
    w_blk = (jnp.eye(pack, dtype=jnp.float32)[:, :, None] * w_row[None, :, :]
             ).reshape(pack, fp)
    m = _round_up(pack, 8)
    if m != pack:
        w_blk = jnp.pad(w_blk, ((0, m - pack), (0, 0)))
    w_blk = w_blk.astype(x.dtype)        # match MXU operand dtype; accumulation stays f32

    bias_f32 = bias.reshape(1).astype(jnp.float32)

    # --- batch tiling / VMEM budget (generation-aware via physical VMEM size).
    vmem_cap = _vmem_capacity_bytes()
    if batch_tile is None:
        tb = _pick_batch_tile(rows, fp * itemsize, target_bytes=vmem_cap // 8)
    else:
        tb = min(int(batch_tile), rows)
    grid = (pl.cdiv(rows, tb),)
    tile_bytes = tb * fp * itemsize
    vmem_limit = int(min(vmem_cap * 3 // 4, 2 * tile_bytes + (16 << 20)))

    cost = pl.CostEstimate(
        flops=2 * rows * m * fp,
        transcendentals=0,
        bytes_accessed=(rows * fp * itemsize
                        + w_blk.size * w_blk.dtype.itemsize
                        + m * rows * jnp.dtype(out_dtype).itemsize + 4),
    )

    out = pl.pallas_call(
        _linear_kernel,
        out_shape=jax.ShapeDtypeStruct((m, rows), out_dtype),
        grid=grid,
        in_specs=[
            pl.BlockSpec((tb, fp), lambda i: (i, 0)),             # x: streamed batch tiles
            pl.BlockSpec((m, fp), lambda i: (0, 0)),              # weight: VMEM-resident
            pl.BlockSpec(memory_space=pltpu.MemorySpace.SMEM),    # bias: SMEM scalar
        ],
        out_specs=pl.BlockSpec((m, tb), lambda i: (0, i)),        # lane-dense output slab
        compiler_params=pltpu.CompilerParams(
            dimension_semantics=("parallel",),     # megacore sharding on v7x
            vmem_limit_bytes=vmem_limit,
        ),
        cost_estimate=cost,
    )(x_in, w_blk, bias_f32)

    # Un-pack (m, rows) -> (B, 1): out[p, i] is the result for logical row i*P + p.
    return jnp.transpose(out[:pack]).reshape(bp, 1)[:B]


if __name__ == "__main__":
    key = jax.random.PRNGKey(0)
    kx1, kx2, kx3, kw, kb = jax.random.split(key, 5)

    def ref(x, w, b):
        return jnp.dot(x, w.T, precision=jax.lax.Precision.HIGHEST) + b

    # Tolerance note: loose enough to absorb possible MXU-pass vs XLA-reference
    # precision differences for f32 matmuls; logic bugs produce O(0.1-1) errors.
    TOL = 1e-2

    in_features = 32
    bound = 1.0 / jnp.sqrt(jnp.float32(in_features))
    weight = jax.random.uniform(kw, (1, in_features), jnp.float32, -bound, bound)
    bias = jax.random.uniform(kb, (1,), jnp.float32, -bound, bound)

    # 1) Tiny batch, narrow features -> lane-packed path (P=4), single full block.
    x1 = jax.random.normal(kx1, (8, in_features), jnp.float32)
    y1 = jax.block_until_ready(logistic_regression_reg_forward(x1, weight, bias))
    assert y1.shape == (8, 1)
    assert jnp.allclose(y1, ref(x1, weight, bias), atol=TOL, rtol=TOL), "mismatch (packed, single block)"

    # 2) Multi-tile + ragged last tile on the lane-packed path:
    #    1040 rows -> 260 packed rows -> grid of 3 with batch_tile=128 packed rows.
    x2 = jax.random.normal(kx2, (1040, in_features), jnp.float32)
    y2 = jax.block_until_ready(
        logistic_regression_reg_forward(x2, weight, bias, batch_tile=128))
    assert y2.shape == (1040, 1)
    assert jnp.allclose(y2, ref(x2, weight, bias), atol=TOL, rtol=TOL), "mismatch (packed, tiled)"

    # 3) Feature dim already lane-dense (F % 128 == 0 -> pack = 1, plain MXU matvec).
    f3 = 128
    b3 = 1.0 / jnp.sqrt(jnp.float32(f3))
    w3 = jax.random.uniform(kw, (1, f3), jnp.float32, -b3, b3)
    x3 = jax.random.normal(kx3, (48, f3), jnp.float32)
    y3 = jax.block_until_ready(logistic_regression_reg_forward(x3, w3, bias))
    assert y3.shape == (48, 1)
    assert jnp.allclose(y3, ref(x3, w3, bias), atol=TOL, rtol=TOL), "mismatch (unpacked)"

    print("KERNEL_OK")
</pallas_src>

<mosaic_0001>
module attributes {stable_mosaic.version = 11 : i64} {
  func.func @_linear_kernel(%arg0: i32, %arg1: memref<2x128xf32, #tpu.memory_space<vmem>>, %arg2: memref<8x128xf32, #tpu.memory_space<vmem>>, %arg3: memref<1xf32, #tpu.memory_space<smem>>, %arg4: memref<8x2xf32, #tpu.memory_space<vmem>>) attributes {dimension_semantics = [#tpu.dimension_semantics<parallel>], iteration_bounds = array<i64: 1>, scalar_prefetch = 0 : i64, scratch_operands = 0 : i64, tpu.core_type = #tpu.core_type<tc>, window_params = [{transform_indices = @transform_0, window_bounds = array<i64: 2, 128>}, {pipeline_mode = #tpu.pipeline_mode<synchronous>, transform_indices = @transform_1, window_bounds = array<i64: 8, 128>}, {transform_indices = @transform_2, window_bounds = array<i64: 1>}, {transform_indices = @transform_3, window_bounds = array<i64: 8, 2>}]} {
    %c0 = arith.constant 0 : index
    %c0_0 = arith.constant 0 : index
    %0 = vector.load %arg2[%c0, %c0_0] : memref<8x128xf32, #tpu.memory_space<vmem>>, vector<8x128xf32>
    %c0_1 = arith.constant 0 : index
    %c0_2 = arith.constant 0 : index
    %1 = vector.load %arg1[%c0_1, %c0_2] : memref<2x128xf32, #tpu.memory_space<vmem>>, vector<2x128xf32>
    %cst = arith.constant dense<0.000000e+00> : vector<8x2xf32>
    %2 = tpu.matmul %0, %1, %cst {dimension_numbers = #tpu.dot_dimension_numbers<[1], [1], [0], [0], [0, 0, 1, 0], [], []>} : vector<8x128xf32>, vector<2x128xf32>, vector<8x2xf32> -> vector<8x2xf32>
    %c0_3 = arith.constant 0 : index
    %3 = memref.load %arg3[%c0_3] : memref<1xf32, #tpu.memory_space<smem>>
    %4 = vector.broadcast %3 : f32 to vector<8x2xf32>
    %5 = arith.addf %2, %4 : vector<8x2xf32>
    %c0_4 = arith.constant 0 : index
    %c0_5 = arith.constant 0 : index
    %6 = vector.load %arg4[%c0_4, %c0_5] : memref<8x2xf32, #tpu.memory_space<vmem>>, vector<8x2xf32>
    tpu.vector_store %arg4[%c0_4, %c0_5], %5 {strides = array<i32>} : memref<8x2xf32, #tpu.memory_space<vmem>>, vector<8x2xf32>,
    return
  }
  func.func @transform_0(%arg0: i32) -> (i32, i32) {
    %c0_i32 = arith.constant 0 : i32
    %c0_i32_0 = arith.constant 0 : i32
    return %arg0, %c0_i32 : i32, i32
  }
  func.func @transform_1(%arg0: i32) -> (i32, i32) {
    %c0_i32 = arith.constant 0 : i32
    %c0_i32_0 = arith.constant 0 : i32
    %c0_i32_1 = arith.constant 0 : i32
    return %c0_i32, %c0_i32_0 : i32, i32
  }
  func.func @transform_2(%arg0: i32) -> i32 {
    %c0_i32 = arith.constant 0 : i32
    %c0_i32_0 = arith.constant 0 : i32
    return %c0_i32 : i32
  }
  func.func @transform_3(%arg0: i32) -> (i32, i32) {
    %c0_i32 = arith.constant 0 : i32
    %c0_i32_0 = arith.constant 0 : i32
    return %c0_i32, %arg0 : i32, i32
  }
}

</mosaic_0001>

<bundles_post_ra>
// kernel: tpu_custom_call.1
= control target key start
LH: loop header
LB: loop body
LE: loop exit
PB: predicated region body
PF: predicated region fallthrough
CT: control target
= control target key end

     0   :  { %9 = vsyncpa [#allocation4], 0  ;;  %s142_s12 = smov [#allocation3]   ;;  %s186_s0 = inlined_call_operand.vmem [shape: f32[2,128], index: 0, kind: input, shape index: {}]   ;;  %s187_s1 = inlined_call_operand.hbm [shape: f32[8,128], index: 1, kind: input, shape index: {}]   ;;  %s188_s2 = inlined_call_operand.<no memory space> [shape: f32[1], index: 2, kind: input, shape index: {}]   ;;  %s189_s3 = inlined_call_operand.vmem [shape: f32[8,2], index: 3, kind: output, shape index: {}]  }
   0x1   :  { %s18_s13 = sshll.u32 %s142_s12, 4  ;;  %s118_s16 = scalar_lea.hbm %s187_s1, 128  ;;  %s19_s13 = int_to_ptr.vmem [resolvable:$true] %s18_s13 }
   0x2   :  { %p119_p0 = scmp.ne.s32.totalorder %s187_s1, %s118_s16  ;;  %p122_p1 = scmp.lt.u32.totalorder %s118_s16, %s187_s1 }
   0x4   :  { %p124_p2 = pnand %p122_p1, %p119_p0 }
   0x6   :  { %127 = shalt.err (!%p124_p2)
}
   0x7   :  { %s128_s21 = scalar_lea.vmem %s19_s13, 128  ;;  %p133_p4 = scmp.lt.s32.totalorder %s19_s13, %s19_s13 }
   0x8   :  { %p129_p3 = scmp.ne.s32.totalorder %s19_s13, %s128_s21  ;;  %p134_p5 = scmp.lt.s32.totalorder %s128_s21, %s128_s21 }
   0xa   :  { %p135_p6 = por %p134_p5, %p133_p4 }
   0xc   :  { %p136_p7 = pnand %p135_p6, %p129_p3 }
   0xe   :  { %139 = shalt.err (!%p136_p7)
}
   0xf   :  { %21 = dma.hbm_to_vmem [thread:$0]  %s187_s1, 128, %s19_s13, [#allocation4]  }
  0x10   :  { %140 = dma.done.wait [#allocation4], 128  }
  0x11   :  { %141 = vsyncadd [#allocation4], 4294967168  ;;  %v143_v0 = vmov 0.0   ;;  %vm144_vm0 = vmmov 0   ;;  %v28_v1 = vld [vmem:[%s186_s0] sm:$0x3]  ;;  %v30_v3 = vstv %s188_s2 }
  0x12   :  { %110 = vmatprep.subr.mxu0 %v143_v0  ;;  %112 = vmatprep.mubr.msk.f32.mxu0 %vm144_vm0, %v143_v0  ;;  %v27_v2 = vld [vmem:[#allocation3] sm:$0xff]  ;;  %vm101_vm1 = vcmask 15360  }
  0x13   :  { %111 = vmatpush3.xpose.msra.mxu0 %v28_v1 }
  0x16   :  { %113 = vmatmul.mubr.f32.vlgmr.msra.gmra.mrb[0].mxu0 %v27_v2 }
  0xe9   :  { %v97_v4 = vpop.f32.mrb[0].mxu0 }
  0xea   :  { %v98_v5 = vadd.f32 %v97_v4, %v30_v3  ;;  %v114_v6 = vpop.f32.mrb[1].mxu0 }
  0xec   :  { %102 = vst.msk [vmem:[%s189_s3] sm:$0xff] %vm101_vm1, %v98_v5 }
  0xed   :  { %107 = vsyncpa [#allocation4], 1 }

</bundles_post_ra>
